<compile_context>
chip_gen: v5e
topology: v5e:2x2
jax: 0.10.0
libtpu: 0.0.40
codegen_flags: <defaults>
</compile_context>

<pallas_src>
import functools

import jax
import jax.numpy as jnp
from jax import lax
from jax.experimental import pallas as pl
from jax.experimental.pallas import tpu as pltpu

_SUB = 8                 # f32 sublanes per vreg tile
_LANES = 128             # lanes per vreg tile
_MAX_BLOCK_ROWS = 2048   # (2048, 128) f32 block = 1 MiB per stream
_NUM_SPLITS = 2          # leading "parallel" axis (2 TensorCores on v7x)


def _round_up(x, m):
    return (x + m - 1) // m * m


def _focal_weight(one_minus_pt, gamma):
    """(1 - pt) ** gamma; VALU multiplies when gamma is a small integer."""
    g = float(gamma)
    if g == 0.0:
        return jnp.ones_like(one_minus_pt)
    if g == int(g) and 0 < g <= 8:
        out = one_minus_pt
        for _ in range(int(g) - 1):
            out = out * one_minus_pt
        return out
    return one_minus_pt ** g


def _focal_loss_kernel(x_ref, t_ref, o_ref, acc_ref, *, alpha, gamma, count,
                       block_rows, blocks_per_split):
    c = pl.program_id(0)          # split (core) index
    j = pl.program_id(1)          # block index within the split

    @pl.when(j == 0)
    def _():
        acc_ref[...] = jnp.zeros_like(acc_ref)

    x = x_ref[...].astype(jnp.float32)
    t = t_ref[...].astype(jnp.float32)

    # numerically-stable binary_cross_entropy_with_logits (reduction='none')
    bce = jnp.maximum(x, 0.0) - x * t + jnp.log1p(jnp.exp(-jnp.abs(x)))
    pt = jnp.exp(-bce)
    fl = _focal_weight(1.0 - pt, gamma) * bce      # alpha folded into the end

    block_elems = block_rows * _LANES
    start = (c * blocks_per_split + j) * block_elems   # logical global offset

    def _accumulate(vals):
        # vreg-shaped accumulation: plain VPU adds, no serial scalar chain
        acc_ref[...] += jnp.sum(
            vals.reshape(block_rows // _SUB, _SUB, _LANES), axis=0)

    @pl.when(start + block_elems <= count)
    def _():                                        # fully in-range block
        _accumulate(fl)

    @pl.when(start + block_elems > count)
    def _():                                        # tail / overhanging block
        row = lax.broadcasted_iota(jnp.int32, fl.shape, 0)
        col = lax.broadcasted_iota(jnp.int32, fl.shape, 1)
        gidx = start + row * _LANES + col
        _accumulate(jnp.where(gidx < count, fl, 0.0))

    @pl.when(j == pl.num_programs(1) - 1)
    def _():
        o_ref[...] = (jnp.sum(acc_ref[...], keepdims=True)
                      * (alpha / count)).astype(o_ref.dtype)


def focal_loss(inputs, targets, alpha=2.0, gamma=2):
    x = jnp.asarray(inputs)       # keep native dtype; cast to f32 in-kernel
    t = jnp.asarray(targets)
    n = int(x.size)
    if n == 0:
        return jnp.float32(float("nan"))   # torch: mean of empty -> nan

    x = x.reshape(-1)
    t = t.reshape(-1)

    rows = pl.cdiv(n, _LANES)
    padded = rows * _LANES
    if padded != n:
        # minimal lane pad (< 128 elems); padded tail is masked in-kernel
        x = jnp.pad(x, (0, padded - n))
        t = jnp.pad(t, (0, padded - n))
    x = x.reshape(rows, _LANES)
    t = t.reshape(rows, _LANES)

    block_rows = min(_MAX_BLOCK_ROWS, _round_up(rows, _SUB))
    num_blocks = pl.cdiv(rows, block_rows)
    num_splits = min(_NUM_SPLITS, num_blocks)
    bps = pl.cdiv(num_blocks, num_splits)

    def in_map(c, j):
        # clamp so an overhanging split never issues an out-of-range block DMA;
        # its contribution is zeroed by the in-kernel index mask.
        return (jnp.minimum(c * bps + j, num_blocks - 1), 0)

    blk = pl.BlockSpec((block_rows, _LANES), in_map)

    kernel = functools.partial(
        _focal_loss_kernel,
        alpha=float(alpha), gamma=float(gamma), count=n,
        block_rows=block_rows, blocks_per_split=bps)

    partials = pl.pallas_call(
        kernel,
        out_shape=jax.ShapeDtypeStruct((num_splits, 1), jnp.float32),
        grid_spec=pltpu.PrefetchScalarGridSpec(
            num_scalar_prefetch=0,
            grid=(num_splits, bps),
            in_specs=[blk, blk],
            out_specs=pl.BlockSpec((1, 1), lambda c, j: (c, 0)),
            scratch_shapes=[pltpu.VMEM((_SUB, _LANES), jnp.float32)],
        ),
        compiler_params=pltpu.CompilerParams(
            dimension_semantics=("parallel", "arbitrary"),
            vmem_limit_bytes=32 * 1024 * 1024,
        ),
    )(x, t)
    return jnp.sum(partials)


def _focal_loss_ref(inputs, targets, alpha=2.0, gamma=2):
    x = jnp.asarray(inputs, jnp.float32)
    t = jnp.asarray(targets, jnp.float32)
    bce = jnp.maximum(x, 0.0) - x * t + jnp.log1p(jnp.exp(-jnp.abs(x)))
    pt = jnp.exp(-bce)
    return jnp.mean(alpha * (1.0 - pt) ** gamma * bce)


if __name__ == "__main__":
    key = jax.random.PRNGKey(0)
    k1, k2, k3, k4 = jax.random.split(key, 4)

    # primary: logits / binary targets shaped like a conv-net output head
    x = jax.random.normal(k1, (2, 4, 16, 16), dtype=jnp.float32)
    t = (jax.random.uniform(k2, (2, 4, 16, 16)) > 0.5).astype(jnp.float32)
    loss = jax.block_until_ready(focal_loss(x, t, alpha=2.0, gamma=2))
    ref = _focal_loss_ref(x, t, alpha=2.0, gamma=2)
    assert jnp.allclose(loss, ref, rtol=1e-5, atol=1e-6), (loss, ref)

    # ragged element count (not a multiple of 128) -> in-kernel tail masking
    x2 = jax.random.normal(k3, (3, 5, 7, 11), dtype=jnp.float32)
    t2 = (jax.random.uniform(k4, (3, 5, 7, 11)) > 0.5).astype(jnp.float32)
    loss2 = jax.block_until_ready(focal_loss(x2, t2, alpha=2.0, gamma=2))
    ref2 = _focal_loss_ref(x2, t2, alpha=2.0, gamma=2)
    assert jnp.allclose(loss2, ref2, rtol=1e-5, atol=1e-6), (loss2, ref2)

    # multi-block + two-split path, bf16 inputs kept in native dtype
    kb1, kb2 = jax.random.split(k4)
    x3 = jax.random.normal(kb1, (2, 8, 160, 160), dtype=jnp.bfloat16)
    t3 = (jax.random.uniform(kb2, (2, 8, 160, 160)) > 0.5).astype(jnp.bfloat16)
    loss3 = jax.block_until_ready(focal_loss(x3, t3, alpha=2.0, gamma=2))
    ref3 = _focal_loss_ref(x3, t3, alpha=2.0, gamma=2)
    assert jnp.allclose(loss3, ref3, rtol=1e-4, atol=1e-6), (loss3, ref3)

    print("KERNEL_OK")
</pallas_src>

<mosaic_0001>
module attributes {stable_mosaic.version = 11 : i64} {
  func.func @_focal_loss_kernel(%arg0: i32, %arg1: i32, %arg2: memref<16x128xf32, #tpu.memory_space<vmem>>, %arg3: memref<16x128xf32, #tpu.memory_space<vmem>>, %arg4: memref<1x1xf32, #tpu.memory_space<vmem>>, %arg5: memref<8x128xf32, #tpu.memory_space<vmem>>) attributes {dimension_semantics = [#tpu.dimension_semantics<parallel>, #tpu.dimension_semantics<arbitrary>], iteration_bounds = array<i64: 1, 1>, scalar_prefetch = 0 : i64, scratch_operands = 1 : i64, tpu.core_type = #tpu.core_type<tc>, window_params = [{transform_indices = @transform_0, window_bounds = array<i64: 16, 128>}, {transform_indices = @transform_1, window_bounds = array<i64: 16, 128>}, {transform_indices = @transform_2, window_bounds = array<i64: 1, 1>}]} {
    %c0_i32 = arith.constant 0 : i32
    %0 = arith.cmpi eq, %arg1, %c0_i32 : i32
    %1 = arith.extui %0 : i1 to i32
    %c0_i32_0 = arith.constant 0 : i32
    %2 = arith.cmpi ne, %1, %c0_i32_0 : i32
    scf.if %2 {
      %cst_15 = arith.constant 0.000000e+00 : f32
      %36 = vector.broadcast %cst_15 : f32 to vector<8x128xf32>
      %c0_16 = arith.constant 0 : index
      %c0_17 = arith.constant 0 : index
      %37 = vector.load %arg5[%c0_16, %c0_17] : memref<8x128xf32, #tpu.memory_space<vmem>>, vector<8x128xf32>
      tpu.vector_store %arg5[%c0_16, %c0_17], %36 {strides = array<i32>} : memref<8x128xf32, #tpu.memory_space<vmem>>, vector<8x128xf32>,
    } else {
    }
    %c0 = arith.constant 0 : index
    %c0_1 = arith.constant 0 : index
    %3 = vector.load %arg2[%c0, %c0_1] : memref<16x128xf32, #tpu.memory_space<vmem>>, vector<16x128xf32>
    %c0_2 = arith.constant 0 : index
    %c0_3 = arith.constant 0 : index
    %4 = vector.load %arg3[%c0_2, %c0_3] : memref<16x128xf32, #tpu.memory_space<vmem>>, vector<16x128xf32>
    %cst = arith.constant 0.000000e+00 : f32
    %5 = vector.broadcast %cst : f32 to vector<16x128xf32>
    %6 = arith.maximumf %3, %5 : vector<16x128xf32>
    %7 = arith.mulf %3, %4 : vector<16x128xf32>
    %8 = arith.subf %6, %7 : vector<16x128xf32>
    %9 = math.absf %3 : vector<16x128xf32>
    %cst_4 = arith.constant 0.000000e+00 : f32
    %10 = vector.broadcast %cst_4 : f32 to vector<16x128xf32>
    %11 = arith.subf %10, %9 : vector<16x128xf32>
    %12 = math.exp %11 : vector<16x128xf32>
    %13 = math.log1p %12 : vector<16x128xf32>
    %14 = arith.addf %8, %13 : vector<16x128xf32>
    %cst_5 = arith.constant 0.000000e+00 : f32
    %15 = vector.broadcast %cst_5 : f32 to vector<16x128xf32>
    %16 = arith.subf %15, %14 : vector<16x128xf32>
    %17 = math.exp %16 : vector<16x128xf32>
    %cst_6 = arith.constant 1.000000e+00 : f32
    %18 = vector.broadcast %cst_6 : f32 to vector<16x128xf32>
    %19 = arith.subf %18, %17 : vector<16x128xf32>
    %20 = arith.mulf %19, %19 : vector<16x128xf32>
    %21 = arith.mulf %20, %14 : vector<16x128xf32>
    %c1_i32 = arith.constant 1 : i32
    %22 = arith.muli %arg0, %c1_i32 : i32
    %23 = arith.addi %22, %arg1 : i32
    %c2048_i32 = arith.constant 2048 : i32
    %24 = arith.muli %23, %c2048_i32 : i32
    %c2048_i32_7 = arith.constant 2048 : i32
    %25 = arith.addi %24, %c2048_i32_7 : i32
    %c2048_i32_8 = arith.constant 2048 : i32
    %26 = arith.cmpi sle, %25, %c2048_i32_8 : i32
    %27 = arith.extui %26 : i1 to i32
    %c0_i32_9 = arith.constant 0 : i32
    %28 = arith.cmpi ne, %27, %c0_i32_9 : i32
    scf.if %28 {
      %c0_15 = arith.constant 0 : index
      %c0_16 = arith.constant 0 : index
      %36 = vector.load %arg5[%c0_15, %c0_16] : memref<8x128xf32, #tpu.memory_space<vmem>>, vector<8x128xf32>
      %37 = vector.shape_cast %21 : vector<16x128xf32> to vector<2x8x128xf32>
      %cst_17 = arith.constant dense<0.000000e+00> : vector<8x128xf32>
      %38 = vector.multi_reduction <add>, %37, %cst_17 [0] : vector<2x8x128xf32> to vector<8x128xf32>
      %39 = arith.addf %36, %38 : vector<8x128xf32>
      %c0_18 = arith.constant 0 : index
      %c0_19 = arith.constant 0 : index
      %40 = vector.load %arg5[%c0_18, %c0_19] : memref<8x128xf32, #tpu.memory_space<vmem>>, vector<8x128xf32>
      tpu.vector_store %arg5[%c0_18, %c0_19], %39 {strides = array<i32>} : memref<8x128xf32, #tpu.memory_space<vmem>>, vector<8x128xf32>,
    } else {
    }
    %c2048_i32_10 = arith.constant 2048 : i32
    %29 = arith.addi %24, %c2048_i32_10 : i32
    %c2048_i32_11 = arith.constant 2048 : i32
    %30 = arith.cmpi sgt, %29, %c2048_i32_11 : i32
    %31 = arith.extui %30 : i1 to i32
    %c0_i32_12 = arith.constant 0 : i32
    %32 = arith.cmpi ne, %31, %c0_i32_12 : i32
    scf.if %32 {
      %36 = tpu.iota {dimensions = array<i32: 0>} : vector<16x128xi32>
      %37 = tpu.iota {dimensions = array<i32: 1>} : vector<16x128xi32>
      %c128_i32 = arith.constant 128 : i32
      %38 = vector.broadcast %c128_i32 : i32 to vector<16x128xi32>
      %39 = arith.muli %36, %38 : vector<16x128xi32>
      %40 = vector.broadcast %24 : i32 to vector<16x128xi32>
      %41 = arith.addi %40, %39 : vector<16x128xi32>
      %42 = arith.addi %41, %37 : vector<16x128xi32>
      %c2048_i32_15 = arith.constant 2048 : i32
      %43 = vector.broadcast %c2048_i32_15 : i32 to vector<16x128xi32>
      %44 = arith.cmpi slt, %42, %43 : vector<16x128xi32>
      %cst_16 = arith.constant 0.000000e+00 : f32
      %45 = vector.broadcast %cst_16 : f32 to vector<16x128xf32>
      %46 = arith.select %44, %21, %45 : vector<16x128xi1>, vector<16x128xf32>
      %c0_17 = arith.constant 0 : index
      %c0_18 = arith.constant 0 : index
      %47 = vector.load %arg5[%c0_17, %c0_18] : memref<8x128xf32, #tpu.memory_space<vmem>>, vector<8x128xf32>
      %48 = vector.shape_cast %46 : vector<16x128xf32> to vector<2x8x128xf32>
      %cst_19 = arith.constant dense<0.000000e+00> : vector<8x128xf32>
      %49 = vector.multi_reduction <add>, %48, %cst_19 [0] : vector<2x8x128xf32> to vector<8x128xf32>
      %50 = arith.addf %47, %49 : vector<8x128xf32>
      %c0_20 = arith.constant 0 : index
      %c0_21 = arith.constant 0 : index
      %51 = vector.load %arg5[%c0_20, %c0_21] : memref<8x128xf32, #tpu.memory_space<vmem>>, vector<8x128xf32>
      tpu.vector_store %arg5[%c0_20, %c0_21], %50 {strides = array<i32>} : memref<8x128xf32, #tpu.memory_space<vmem>>, vector<8x128xf32>,
    } else {
    }
    %c0_i32_13 = arith.constant 0 : i32
    %33 = arith.cmpi eq, %arg1, %c0_i32_13 : i32
    %34 = arith.extui %33 : i1 to i32
    %c0_i32_14 = arith.constant 0 : i32
    %35 = arith.cmpi ne, %34, %c0_i32_14 : i32
    scf.if %35 {
      %c0_15 = arith.constant 0 : index
      %c0_16 = arith.constant 0 : index
      %36 = vector.load %arg5[%c0_15, %c0_16] : memref<8x128xf32, #tpu.memory_space<vmem>>, vector<8x128xf32>
      %37 = vector.shape_cast %36 : vector<8x128xf32> to vector<1x8x128xf32>
      %cst_17 = arith.constant dense<0.000000e+00> : vector<1xf32>
      %38 = vector.multi_reduction <add>, %37, %cst_17 [1, 2] : vector<1x8x128xf32> to vector<1xf32>
      %39 = vector.shape_cast %38 : vector<1xf32> to vector<1x1x1xf32>
      %40 = vector.extract %39[0, 0, 0] : f32 from vector<1x1x1xf32>
      %41 = vector.broadcast %40 : f32 to vector<1x1xf32>
      %cst_18 = arith.constant 9.765625E-4 : f32
      %42 = vector.broadcast %cst_18 : f32 to vector<1x1xf32>
      %43 = arith.mulf %41, %42 : vector<1x1xf32>
      %c0_19 = arith.constant 0 : index
      %c0_20 = arith.constant 0 : index
      %44 = vector.load %arg4[%c0_19, %c0_20] : memref<1x1xf32, #tpu.memory_space<vmem>>, vector<1x1xf32>
      tpu.vector_store %arg4[%c0_19, %c0_20], %43 {strides = array<i32>} : memref<1x1xf32, #tpu.memory_space<vmem>>, vector<1x1xf32>,
    } else {
    }
    return
  }
  func.func @transform_0(%arg0: i32, %arg1: i32) -> (i32, i32) {
    %c1_i32 = arith.constant 1 : i32
    %0 = arith.muli %arg0, %c1_i32 : i32
    %1 = arith.addi %0, %arg1 : i32
    %c0_i32 = arith.constant 0 : i32
    %2 = arith.minsi %1, %c0_i32 : i32
    %c0_i32_0 = arith.constant 0 : i32
    %c0_i32_1 = arith.constant 0 : i32
    return %2, %c0_i32_0 : i32, i32
  }
  func.func @transform_1(%arg0: i32, %arg1: i32) -> (i32, i32) {
    %c1_i32 = arith.constant 1 : i32
    %0 = arith.muli %arg0, %c1_i32 : i32
    %1 = arith.addi %0, %arg1 : i32
    %c0_i32 = arith.constant 0 : i32
    %2 = arith.minsi %1, %c0_i32 : i32
    %c0_i32_0 = arith.constant 0 : i32
    %c0_i32_1 = arith.constant 0 : i32
    return %2, %c0_i32_0 : i32, i32
  }
  func.func @transform_2(%arg0: i32, %arg1: i32) -> (i32, i32) {
    %c0_i32 = arith.constant 0 : i32
    %c0_i32_0 = arith.constant 0 : i32
    return %arg0, %c0_i32 : i32, i32
  }
}

</mosaic_0001>

<bundles_post_ra>
// kernel: tpu_custom_call.1
= control target key start
LH: loop header
LB: loop body
LE: loop exit
PB: predicated region body
PF: predicated region fallthrough
CT: control target
= control target key end

     0   :  { %7 = vsyncpa [#allocation4], 0  ;;  %s319_s0 = inlined_call_operand.hbm [shape: f32[16,128], index: 0, kind: input, shape index: {}]   ;;  %s320_s1 = inlined_call_operand.hbm [shape: f32[16,128], index: 1, kind: input, shape index: {}]   ;;  %s321_s2 = inlined_call_operand.hbm [shape: f32[1,1], index: 2, kind: output, shape index: {}]  }
   0x1   :  { %8 = vsyncpa [#allocation7], 0 }
   0x2   :  { %9 = vsyncpa [#allocation5], 0  ;;  %s20_s11 = sshll.u32 %s319_s0, 4  ;;  %s290_s12 = smov [#allocation3]   ;;  %s21_s11 = int_to_ptr.hbm [resolvable:$true] %s20_s11 }
   0x3   :  { %s22_s13 = sshll.u32 %s290_s12, 4  ;;  %s39_s16 = sshll.u32 %s320_s1, 4  ;;  %s23_s13 = int_to_ptr.vmem [resolvable:$true] %s22_s13  ;;  %s40_s16 = int_to_ptr.hbm [resolvable:$true] %s39_s16 }
   0x4   :  { %s291_s17 = smov 128   ;;  %s292_s18 = smov 8  }
   0x5   :  { %28 = dma.hbm_to_vmem [thread:$0]  %s21_s11, 256, %s23_s13, [#allocation4], %s291_s17, %s291_s17, %s292_s18  }
   0x6   :  { %s293_s19 = smov [#allocation6]  }
   0x7   :  { %s41_s20 = sshll.u32 %s293_s19, 4  ;;  %s42_s20 = int_to_ptr.vmem [resolvable:$true] %s41_s20 }
   0x8   :  { %47 = dma.hbm_to_vmem [thread:$0]  %s40_s16, 256, %s42_s20, [#allocation7], %s291_s17, %s291_s17, %s292_s18  }
   0x9   :  { %284 = dma.done.wait [#allocation4], 256  }
   0xa   :  { %285 = vsyncadd [#allocation4], 4294967040 }
   0xb   :  { %286 = dma.done.wait [#allocation7], 256  }
   0xc   :  { %287 = vsyncadd [#allocation7], 4294967040  ;;  %v69_v0 = vld [vmem:[#allocation3] sm:$0xff]  ;;  %v70_v1 = vld [vmem:[#allocation3 + $0x8] sm:$0xff]  ;;  %s294_s0 = smov [#allocation8]   ;;  %s178_s23 = sshll.u32 %s321_s2, 4  ;;  %s179_s23 = int_to_ptr.hbm [resolvable:$true] %s178_s23 }
   0xd   :  { %v79_v2 = vand.u32 2147483647, %v69_v0  ;;  %v80_v3 = vand.u32 2147483647, %v70_v1  ;;  %v71_v12 = vld [vmem:[#allocation6] sm:$0xff]  ;;  %v72_v15 = vld [vmem:[#allocation6 + $0x8] sm:$0xff] }
   0xe   :  { %v73_v17 = vmax.f32 %v69_v0, 0.0  ;;  %v75_v18 = vmul.f32 %v71_v12, %v69_v0  ;;  %v74_v21 = vmax.f32 %v70_v1, 0.0  ;;  %v76_v22 = vmul.f32 %v72_v15, %v70_v1  ;;  %s176_s1 = sshll.u32 %s294_s0, 4  ;;  %s177_s1 = int_to_ptr.vmem [resolvable:$true] %s176_s1 }
   0xf   :  { %v81_v4 = vsub.f32 0.0, %v79_v2  ;;  %v82_v5 = vsub.f32 0.0, %v80_v3  ;;  %vm169_vm2 = vcmask 0  }
  0x10   :  { %v77_v26 = vsub.f32 %v73_v17, %v75_v18  ;;  %v78_v29 = vsub.f32 %v74_v21, %v76_v22 }
  0x11   :  { %v83_v6 = vmul.f32 1.442695, %v81_v4  ;;  %v85_v7 = vmul.f32 1.442695, %v82_v5 }
  0x13   :  { %200 = vpow2.f32 %v83_v6 }
  0x14   :  { %202 = vpow2.f32 %v85_v7 }
  0x19   :  { %v201_v8 = vpop.eup %200 }
  0x1a   :  { %v203_v9 = vpop.eup %202  ;;  %v87_v10 = vadd.f32 1.0, %v201_v8  ;;  %v90_v11 = vmul.f32 -0.5, %v201_v8  ;;  %v93_v19 = vand.u32 2147483647, %v201_v8 }
  0x1b   :  { %v96_v13 = vadd.f32 1.0, %v203_v9  ;;  %v99_v14 = vmul.f32 -0.5, %v203_v9  ;;  %v102_v23 = vand.u32 2147483647, %v203_v9 }
  0x1c   :  { %204 = vlog2.f32 %v87_v10  ;;  %v91_v16 = vadd.f32 1.0, %v90_v11  ;;  %vm94_vm0 = vcmp.lt.f32.partialorder %v93_v19, 0.0004427343 }
  0x1d   :  { %206 = vlog2.f32 %v96_v13  ;;  %v100_v20 = vadd.f32 1.0, %v99_v14  ;;  %vm103_vm1 = vcmp.lt.f32.partialorder %v102_v23, 0.0004427343 }
  0x1e   :  { %v92_v24 = vmul.f32 %v201_v8, %v91_v16 }
  0x1f   :  { %v101_v27 = vmul.f32 %v203_v9, %v100_v20 }
  0x22   :  { %v205_v25 = vpop.eup %204 }
  0x23   :  { %v207_v28 = vpop.eup %206  ;;  %v89_v30 = vmul.f32 0.6931472, %v205_v25 }
  0x24   :  { %v98_v31 = vmul.f32 0.6931472, %v207_v28 }
  0x25   :  { %v95_v32 = vsel %vm94_vm0, %v92_v24, %v89_v30 }
  0x26   :  { %v104_v33 = vsel %vm103_vm1, %v101_v27, %v98_v31  ;;  %v105_v34 = vadd.f32 %v95_v32, %v77_v26 }
  0x27   :  { %v106_v35 = vadd.f32 %v104_v33, %v78_v29 }
  0x28   :  { %v107_v36 = vsub.f32 0.0, %v105_v34 }
  0x29   :  { %v108_v37 = vsub.f32 0.0, %v106_v35 }
  0x2a   :  { %v109_v38 = vmul.f32 1.442695, %v107_v36 }
  0x2b   :  { %v111_v39 = vmul.f32 1.442695, %v108_v37 }
  0x2c   :  { %208 = vpow2.f32 %v109_v38 }
  0x2d   :  { %210 = vpow2.f32 %v111_v39 }
  0x32   :  { %v209_v40 = vpop.eup %208 }
  0x33   :  { %v211_v41 = vpop.eup %210  ;;  %v113_v42 = vsub.f32 1.0, %v209_v40 }
  0x34   :  { %v114_v43 = vsub.f32 1.0, %v211_v41 }
  0x35   :  { %v115_v44 = vmul.f32 %v113_v42, %v113_v42 }
  0x36   :  { %v116_v45 = vmul.f32 %v114_v43, %v114_v43 }
  0x37   :  { %v117_v46 = vmul.f32 %v115_v44, %v105_v34 }
  0x38   :  { %v118_v47 = vmul.f32 %v116_v45, %v106_v35 }
  0x3a   :  { %v127_v48 = vadd.f32 %v118_v47, %v117_v46 }
  0x3c   :  { %158 = vadd.xlane.f32.xlu0 %v127_v48 }
  0xaf   :  { %v159_v49 = vpop.xlane.xlu0 %158 }
  0xb0   :  { %v160_v50 = vrot.slane %v159_v49, 4 }
  0xb2   :  { %v161_v51 = vadd.f32 %v160_v50, %v159_v49 }
  0xb4   :  { %v162_v52 = vrot.slane %v161_v51, 2 }
  0xb6   :  { %v163_v53 = vadd.f32 %v162_v52, %v161_v51 }
  0xb8   :  { %v164_v54 = vrot.slane %v163_v53, 1 }
  0xba   :  { %v165_v55 = vadd.f32 %v164_v54, %v163_v53 }
  0xbc   :  { %193 = vpush %v165_v55 }
  0xed   :  { %s194_s24 = spop %193 }
  0xee   :  { %v167_v56 = vstv %s194_s24 }
  0xef   :  { %v168_v57 = vmul.f32 0.0009765625, %v167_v56 }
  0xf1   :  { %170 = vst.msk [vmem:[#allocation8] sm:$0x1] %vm169_vm2, %v168_v57 }
  0xf2   :  { %181 = dma.vmem_to_hbm [thread:$0]  %s177_s1, 16, %s179_s23, [#allocation5]  }
  0xf3   :  { %288 = dma.done.wait [#allocation5], 16  }
  0xf4   :  { %289 = vsyncadd [#allocation5], 4294967280 }
  0xf5   :  { %186 = vsyncpa [#allocation4], 1 }
  0xf6   :  { %187 = vsyncpa [#allocation7], 1 }
  0xf7   :  { %188 = vsyncpa [#allocation5], 1 }

</bundles_post_ra>
